<compile_context>
chip_gen: v7x
topology: tpu7x:2x2x1
jax: 0.10.0
libtpu: 0.0.40
codegen_flags: <defaults>
</compile_context>

<pallas_src>
import functools

import jax
import jax.numpy as jnp
import numpy as np
from jax.experimental import pallas as pl
from jax.experimental.pallas import tpu as pltpu


# ----------------------------------------------------------------------------
# Fast path: stride-1 "same" depthwise conv (the MobileNet 3x3 / pad 1 block),
# lane-dense layout: x block is (1, Cb, H*W) with H*W on the lane axis.
# ----------------------------------------------------------------------------
def _dwconv_same_kernel(x_ref, w_ref, b_ref, o_ref, *, h, w, kh_size, kw_size,
                        pad):
    """Fused depthwise 'same' conv (stride 1) + folded-BN bias + ReLU.

    x_ref: (1, Cb, H*W)   input tile (flattened spatial on lanes)
    w_ref: (Cb, kH*kW)    depthwise filter, BN scale already folded in
    b_ref: (Cb, 1)        folded BN bias
    o_ref: (1, Cb, H*W)   output tile
    """
    hw = h * w
    cb = x_ref.shape[1]

    w_all = w_ref[...].astype(jnp.float32)          # load filter once (Cb, kH*kW)
    b_col = b_ref[...].astype(jnp.float32)          # (Cb, 1)

    # Column index of every flattened spatial position (for W-edge masking).
    col = jax.lax.broadcasted_iota(jnp.int32, (1, hw), 1) % w

    acc = jnp.zeros((cb, hw), jnp.float32)
    for i_kh in range(kh_size):                     # unrolled: kH*kW taps
        for i_kw in range(kw_size):
            # Tap (i_kh, i_kw) needs input (ho + i_kh - pad, wo + i_kw - pad),
            # i.e. a shift of `s` along the flattened axis.  Zero fill at the
            # ends supplies the H-edge padding; the column mask supplies the
            # W-edge padding (row-wraparound positions are always col-invalid).
            s = (i_kh - pad) * w + (i_kw - pad)
            if s > 0:
                part = x_ref[0, :, s:hw].astype(jnp.float32)
                shifted = jnp.concatenate(
                    [part, jnp.zeros((cb, s), jnp.float32)], axis=1)
            elif s < 0:
                part = x_ref[0, :, 0:hw + s].astype(jnp.float32)
                shifted = jnp.concatenate(
                    [jnp.zeros((cb, -s), jnp.float32), part], axis=1)
            else:
                shifted = x_ref[0, :, :].astype(jnp.float32)

            off = i_kw - pad
            if off != 0:
                valid = jnp.logical_and(col + off >= 0, col + off < w)
                shifted = jnp.where(valid, shifted, 0.0)

            tap = i_kh * kw_size + i_kw
            acc = acc + shifted * w_all[:, tap:tap + 1]   # per-channel weight

    o_ref[0, :, :] = jnp.maximum(acc + b_col, 0.0).astype(o_ref.dtype)


def _pick_channel_tile(c, hw):
    """Channel tile: multiple of 8 (sublane tiling) or the full C; ~2 MiB blocks."""
    if c % 8 != 0:
        return c                       # small / odd C: take the full channel dim
    target = max(8, (2 * 1024 * 1024) // (4 * hw))
    c_blk = min(c, (target // 8) * 8)
    while c % c_blk:
        c_blk -= 8
    return c_blk


def _dwconv_same_lane_dense(x, w_folded, bias, kh, kw, pad):
    n, c, h, w = x.shape
    hw = h * w
    c_blk = _pick_channel_tile(c, hw)

    # Row-major collapses / expands only — no HBM transpose or pad passes.
    x_flat = x.reshape(n, c, hw)
    w_flat = w_folded.reshape(c, kh * kw)
    b_col = bias.reshape(c, 1)

    kernel = functools.partial(_dwconv_same_kernel, h=h, w=w,
                               kh_size=kh, kw_size=kw, pad=pad)
    out_flat = pl.pallas_call(
        kernel,
        out_shape=jax.ShapeDtypeStruct((n, c, hw), x.dtype),
        grid_spec=pl.GridSpec(
            grid=(n, c // c_blk),
            in_specs=[
                pl.BlockSpec((1, c_blk, hw), lambda i, j: (i, j, 0)),
                pl.BlockSpec((c_blk, kh * kw), lambda i, j: (j, 0)),
                pl.BlockSpec((c_blk, 1), lambda i, j: (j, 0)),
            ],
            out_specs=pl.BlockSpec((1, c_blk, hw), lambda i, j: (i, j, 0)),
        ),
        compiler_params=pltpu.CompilerParams(
            dimension_semantics=("parallel", "parallel"),
            vmem_limit_bytes=32 * 1024 * 1024,
        ),
    )(x_flat, w_flat, b_col)
    return out_flat.reshape(n, c, h, w)


# ----------------------------------------------------------------------------
# Fallback path for strided / non-'same' configurations of the module.
# ----------------------------------------------------------------------------
def _dwconv_general_kernel(x_ref, w_ref, b_ref, o_ref, *, kh_size, kw_size,
                           h_out, w_out, stride):
    """x_ref: (1, Hp, Wp, C) padded NHWC tile; w_ref: (kH, kW, C); b_ref: (1, C)."""
    x = x_ref[0].astype(jnp.float32)
    acc = jnp.zeros((h_out, w_out, x.shape[-1]), jnp.float32)
    for i_kh in range(kh_size):
        for i_kw in range(kw_size):
            patch = x[i_kh:i_kh + h_out * stride:stride,
                      i_kw:i_kw + w_out * stride:stride, :]
            acc = acc + patch * w_ref[i_kh, i_kw, :].astype(jnp.float32)
    o_ref[0] = jnp.maximum(acc + b_ref[0].astype(jnp.float32),
                           0.0).astype(o_ref.dtype)


def _dwconv_general(x_nchw, w_folded, bias, kh, kw, padding, stride,
                    h_out, w_out):
    # TODO(synk): fallback (stride != 1 / non-'same' padding) still pays the
    # NCHW<->NHWC transpose and jnp.pad HBM passes; only the stride-1 'same'
    # path above is fully optimised.
    n, c, h, w = x_nchw.shape
    x_nhwc = jnp.transpose(x_nchw, (0, 2, 3, 1))
    x_pad = jnp.pad(x_nhwc, ((0, 0), (padding, padding),
                             (padding, padding), (0, 0)))
    hp, wp = x_pad.shape[1], x_pad.shape[2]
    w_khwc = jnp.transpose(w_folded, (1, 2, 0))               # (kH, kW, C)
    b_row = bias.reshape(1, c)

    kernel = functools.partial(_dwconv_general_kernel, kh_size=kh, kw_size=kw,
                               h_out=h_out, w_out=w_out, stride=stride)
    out_nhwc = pl.pallas_call(
        kernel,
        out_shape=jax.ShapeDtypeStruct((n, h_out, w_out, c), x_nchw.dtype),
        grid_spec=pl.GridSpec(
            grid=(n,),
            in_specs=[
                pl.BlockSpec((1, hp, wp, c), lambda i: (i, 0, 0, 0)),
                pl.BlockSpec((kh, kw, c), lambda i: (0, 0, 0)),
                pl.BlockSpec((1, c), lambda i: (0, 0)),
            ],
            out_specs=pl.BlockSpec((1, h_out, w_out, c), lambda i: (i, 0, 0, 0)),
        ),
        compiler_params=pltpu.CompilerParams(
            dimension_semantics=("parallel",)),
    )(x_pad, w_khwc, b_row)
    return jnp.transpose(out_nhwc, (0, 3, 1, 2))


# ----------------------------------------------------------------------------
# Public wrapper: matches the PyTorch DepthwiseConv forward (inference).
# ----------------------------------------------------------------------------
def depthwise_conv_bn_relu(x_nchw, weight, gamma, beta, running_mean,
                           running_var, *, padding, stride, eps=1e-5):
    """x_nchw: (N, C, H, W); weight: (C, 1, kH, kW) as in nn.Conv2d(groups=C)."""
    n, c, h, w = x_nchw.shape
    kh, kw = weight.shape[2], weight.shape[3]
    h_out = (h + 2 * padding - kh) // stride + 1
    w_out = (w + 2 * padding - kw) // stride + 1

    # Fold BatchNorm (inference) into the conv: w' = w*scale, b = beta - mean*scale.
    scale = gamma * jax.lax.rsqrt(running_var.astype(jnp.float32) + eps)
    bias = beta - running_mean * scale
    w_folded = weight[:, 0, :, :] * scale[:, None, None]       # (C, kH, kW)

    if stride == 1 and h_out == h and w_out == w:
        return _dwconv_same_lane_dense(x_nchw, w_folded, bias, kh, kw, padding)
    return _dwconv_general(x_nchw, w_folded, bias, kh, kw, padding, stride,
                           h_out, w_out)


def _reference(x_nchw, weight, gamma, beta, running_mean, running_var,
               *, padding, stride, eps=1e-5):
    c = x_nchw.shape[1]
    conv = jax.lax.conv_general_dilated(
        x_nchw, weight,
        window_strides=(stride, stride),
        padding=((padding, padding), (padding, padding)),
        dimension_numbers=("NCHW", "OIHW", "NCHW"),
        feature_group_count=c)
    scale = gamma / jnp.sqrt(running_var + eps)
    bias = beta - running_mean * scale
    y = conv * scale[None, :, None, None] + bias[None, :, None, None]
    return jnp.maximum(y, 0.0)


if __name__ == "__main__":
    # DepthwiseConv(in_features=4, out_features=4, kernel_size=3, padding=1, stride=1)
    N, C, H, W = 2, 4, 16, 16
    KH = KW = 3
    PADDING, STRIDE = 1, 1

    key = jax.random.PRNGKey(0)
    kx, kw_, kg, kb, km, kv = jax.random.split(key, 6)
    x = jax.random.normal(kx, (N, C, H, W), dtype=jnp.float32)
    # nn.Conv2d(groups=C, bias=False) weight shape: (out_ch, in_ch/groups, kH, kW)
    weight = jax.random.normal(kw_, (C, 1, KH, KW), dtype=jnp.float32) * 0.2
    # BatchNorm2d params / running stats (deterministic, inference semantics).
    gamma = 1.0 + 0.1 * jax.random.normal(kg, (C,), dtype=jnp.float32)
    beta = 0.1 * jax.random.normal(kb, (C,), dtype=jnp.float32)
    running_mean = 0.1 * jax.random.normal(km, (C,), dtype=jnp.float32)
    running_var = jnp.abs(jax.random.normal(kv, (C,), dtype=jnp.float32)) + 0.5

    out = depthwise_conv_bn_relu(x, weight, gamma, beta, running_mean,
                                 running_var, padding=PADDING, stride=STRIDE)
    out = jax.block_until_ready(out)

    ref = _reference(x, weight, gamma, beta, running_mean, running_var,
                     padding=PADDING, stride=STRIDE)
    np.testing.assert_allclose(np.asarray(out), np.asarray(ref),
                               rtol=1e-5, atol=1e-5)
    print("KERNEL_OK")
</pallas_src>

<mosaic_0001>
module attributes {stable_mosaic.version = 11 : i64} {
  func.func @_dwconv_same_kernel(%arg0: i32, %arg1: i32, %arg2: memref<1x4x256xf32, #tpu.memory_space<vmem>>, %arg3: memref<4x9xf32, #tpu.memory_space<vmem>>, %arg4: memref<4x1xf32, #tpu.memory_space<vmem>>, %arg5: memref<1x4x256xf32, #tpu.memory_space<vmem>>) attributes {dimension_semantics = [#tpu.dimension_semantics<parallel>, #tpu.dimension_semantics<parallel>], iteration_bounds = array<i64: 2, 1>, scalar_prefetch = 0 : i64, scratch_operands = 0 : i64, tpu.core_type = #tpu.core_type<tc>, window_params = [{transform_indices = @transform_0, window_bounds = array<i64: 1, 4, 256>}, {transform_indices = @transform_1, window_bounds = array<i64: 4, 9>}, {transform_indices = @transform_2, window_bounds = array<i64: 4, 1>}, {transform_indices = @transform_3, window_bounds = array<i64: 1, 4, 256>}]} {
    %c0 = arith.constant 0 : index
    %c0_0 = arith.constant 0 : index
    %0 = vector.load %arg3[%c0, %c0_0] : memref<4x9xf32, #tpu.memory_space<vmem>>, vector<4x9xf32>
    %c0_1 = arith.constant 0 : index
    %c0_2 = arith.constant 0 : index
    %1 = vector.load %arg4[%c0_1, %c0_2] : memref<4x1xf32, #tpu.memory_space<vmem>>, vector<4x1xf32>
    %2 = tpu.iota {dimensions = array<i32: 1>} : vector<1x256xi32>
    %c16_i32 = arith.constant 16 : i32
    %c0_i32 = arith.constant 0 : i32
    %3 = arith.cmpi eq, %c16_i32, %c0_i32 : i32
    %c1_i32 = arith.constant 1 : i32
    %4 = arith.select %3, %c1_i32, %c16_i32 : i32
    %5 = vector.broadcast %4 : i32 to vector<1x256xi32>
    %6 = arith.remsi %2, %5 : vector<1x256xi32>
    %c0_i32_3 = arith.constant 0 : i32
    %7 = vector.broadcast %c0_i32_3 : i32 to vector<1x256xi32>
    %8 = arith.cmpi ne, %6, %7 : vector<1x256xi32>
    %c0_i32_4 = arith.constant 0 : i32
    %9 = vector.broadcast %c0_i32_4 : i32 to vector<1x256xi32>
    %10 = arith.cmpi slt, %6, %9 : vector<1x256xi32>
    %c0_i32_5 = arith.constant 0 : i32
    %11 = arith.cmpi slt, %4, %c0_i32_5 : i32
    %12 = vector.broadcast %11 : i1 to vector<1x256xi1>
    %13 = vector.broadcast %12 : vector<1x256xi1> to vector<1x256xi1>
    %14 = arith.xori %10, %13 : vector<1x256xi1>
    %15 = arith.andi %14, %8 : vector<1x256xi1>
    %16 = vector.broadcast %4 : i32 to vector<1x256xi32>
    %17 = arith.addi %6, %16 : vector<1x256xi32>
    %18 = arith.select %15, %17, %6 : vector<1x256xi1>, vector<1x256xi32>
    %cst = arith.constant 0.000000e+00 : f32
    %19 = vector.broadcast %cst : f32 to vector<4x256xf32>
    %c0_6 = arith.constant 0 : index
    %c0_7 = arith.constant 0 : index
    %c0_8 = arith.constant 0 : index
    %20 = vector.load %arg2[%c0_6, %c0_7, %c0_8] : memref<1x4x256xf32, #tpu.memory_space<vmem>>, vector<1x4x239xf32>
    %21 = vector.shape_cast %20 : vector<1x4x239xf32> to vector<4x239xf32>
    %cst_9 = arith.constant 0.000000e+00 : f32
    %22 = vector.broadcast %cst_9 : f32 to vector<4x17xf32>
    %23 = tpu.concatenate %22, %21 in 1 : vector<4x17xf32>, vector<4x239xf32> -> vector<4x256xf32>
    %c-1_i32 = arith.constant -1 : i32
    %24 = vector.broadcast %c-1_i32 : i32 to vector<1x256xi32>
    %25 = arith.addi %18, %24 : vector<1x256xi32>
    %c0_i32_10 = arith.constant 0 : i32
    %26 = vector.broadcast %c0_i32_10 : i32 to vector<1x256xi32>
    %27 = arith.cmpi sge, %25, %26 : vector<1x256xi32>
    %c-1_i32_11 = arith.constant -1 : i32
    %28 = vector.broadcast %c-1_i32_11 : i32 to vector<1x256xi32>
    %29 = arith.addi %18, %28 : vector<1x256xi32>
    %c16_i32_12 = arith.constant 16 : i32
    %30 = vector.broadcast %c16_i32_12 : i32 to vector<1x256xi32>
    %31 = arith.cmpi slt, %29, %30 : vector<1x256xi32>
    %32 = arith.andi %27, %31 : vector<1x256xi1>
    %cst_13 = arith.constant 0.000000e+00 : f32
    %33 = vector.shape_cast %32 : vector<1x256xi1> to vector<1x256xi1>
    %34 = vector.broadcast %33 : vector<1x256xi1> to vector<4x256xi1>
    %35 = vector.broadcast %cst_13 : f32 to vector<4x256xf32>
    %36 = arith.select %34, %23, %35 : vector<4x256xi1>, vector<4x256xf32>
    %37 = vector.extract_strided_slice %0 {offsets = [0, 0], sizes = [4, 1], strides = [1, 1]} : vector<4x9xf32> to vector<4x1xf32>
    %38 = vector.broadcast %37 : vector<4x1xf32> to vector<4x256xf32>
    %39 = arith.mulf %36, %38 : vector<4x256xf32>
    %40 = arith.addf %19, %39 : vector<4x256xf32>
    %c0_14 = arith.constant 0 : index
    %c0_15 = arith.constant 0 : index
    %c0_16 = arith.constant 0 : index
    %41 = vector.load %arg2[%c0_14, %c0_15, %c0_16] : memref<1x4x256xf32, #tpu.memory_space<vmem>>, vector<1x4x240xf32>
    %42 = vector.shape_cast %41 : vector<1x4x240xf32> to vector<4x240xf32>
    %cst_17 = arith.constant 0.000000e+00 : f32
    %43 = vector.broadcast %cst_17 : f32 to vector<4x16xf32>
    %44 = tpu.concatenate %43, %42 in 1 : vector<4x16xf32>, vector<4x240xf32> -> vector<4x256xf32>
    %45 = vector.extract_strided_slice %0 {offsets = [0, 1], sizes = [4, 1], strides = [1, 1]} : vector<4x9xf32> to vector<4x1xf32>
    %46 = vector.broadcast %45 : vector<4x1xf32> to vector<4x256xf32>
    %47 = arith.mulf %44, %46 : vector<4x256xf32>
    %48 = arith.addf %40, %47 : vector<4x256xf32>
    %c0_18 = arith.constant 0 : index
    %c0_19 = arith.constant 0 : index
    %c0_20 = arith.constant 0 : index
    %49 = vector.load %arg2[%c0_18, %c0_19, %c0_20] : memref<1x4x256xf32, #tpu.memory_space<vmem>>, vector<1x4x241xf32>
    %50 = vector.shape_cast %49 : vector<1x4x241xf32> to vector<4x241xf32>
    %cst_21 = arith.constant 0.000000e+00 : f32
    %51 = vector.broadcast %cst_21 : f32 to vector<4x15xf32>
    %52 = tpu.concatenate %51, %50 in 1 : vector<4x15xf32>, vector<4x241xf32> -> vector<4x256xf32>
    %c1_i32_22 = arith.constant 1 : i32
    %53 = vector.broadcast %c1_i32_22 : i32 to vector<1x256xi32>
    %54 = arith.addi %18, %53 : vector<1x256xi32>
    %c0_i32_23 = arith.constant 0 : i32
    %55 = vector.broadcast %c0_i32_23 : i32 to vector<1x256xi32>
    %56 = arith.cmpi sge, %54, %55 : vector<1x256xi32>
    %c1_i32_24 = arith.constant 1 : i32
    %57 = vector.broadcast %c1_i32_24 : i32 to vector<1x256xi32>
    %58 = arith.addi %18, %57 : vector<1x256xi32>
    %c16_i32_25 = arith.constant 16 : i32
    %59 = vector.broadcast %c16_i32_25 : i32 to vector<1x256xi32>
    %60 = arith.cmpi slt, %58, %59 : vector<1x256xi32>
    %61 = arith.andi %56, %60 : vector<1x256xi1>
    %cst_26 = arith.constant 0.000000e+00 : f32
    %62 = vector.shape_cast %61 : vector<1x256xi1> to vector<1x256xi1>
    %63 = vector.broadcast %62 : vector<1x256xi1> to vector<4x256xi1>
    %64 = vector.broadcast %cst_26 : f32 to vector<4x256xf32>
    %65 = arith.select %63, %52, %64 : vector<4x256xi1>, vector<4x256xf32>
    %66 = vector.extract_strided_slice %0 {offsets = [0, 2], sizes = [4, 1], strides = [1, 1]} : vector<4x9xf32> to vector<4x1xf32>
    %67 = vector.broadcast %66 : vector<4x1xf32> to vector<4x256xf32>
    %68 = arith.mulf %65, %67 : vector<4x256xf32>
    %69 = arith.addf %48, %68 : vector<4x256xf32>
    %c0_27 = arith.constant 0 : index
    %c0_28 = arith.constant 0 : index
    %c0_29 = arith.constant 0 : index
    %70 = vector.load %arg2[%c0_27, %c0_28, %c0_29] : memref<1x4x256xf32, #tpu.memory_space<vmem>>, vector<1x4x255xf32>
    %71 = vector.shape_cast %70 : vector<1x4x255xf32> to vector<4x255xf32>
    %cst_30 = arith.constant 0.000000e+00 : f32
    %72 = vector.broadcast %cst_30 : f32 to vector<4x1xf32>
    %73 = tpu.concatenate %72, %71 in 1 : vector<4x1xf32>, vector<4x255xf32> -> vector<4x256xf32>
    %c-1_i32_31 = arith.constant -1 : i32
    %74 = vector.broadcast %c-1_i32_31 : i32 to vector<1x256xi32>
    %75 = arith.addi %18, %74 : vector<1x256xi32>
    %c0_i32_32 = arith.constant 0 : i32
    %76 = vector.broadcast %c0_i32_32 : i32 to vector<1x256xi32>
    %77 = arith.cmpi sge, %75, %76 : vector<1x256xi32>
    %c-1_i32_33 = arith.constant -1 : i32
    %78 = vector.broadcast %c-1_i32_33 : i32 to vector<1x256xi32>
    %79 = arith.addi %18, %78 : vector<1x256xi32>
    %c16_i32_34 = arith.constant 16 : i32
    %80 = vector.broadcast %c16_i32_34 : i32 to vector<1x256xi32>
    %81 = arith.cmpi slt, %79, %80 : vector<1x256xi32>
    %82 = arith.andi %77, %81 : vector<1x256xi1>
    %cst_35 = arith.constant 0.000000e+00 : f32
    %83 = vector.shape_cast %82 : vector<1x256xi1> to vector<1x256xi1>
    %84 = vector.broadcast %83 : vector<1x256xi1> to vector<4x256xi1>
    %85 = vector.broadcast %cst_35 : f32 to vector<4x256xf32>
    %86 = arith.select %84, %73, %85 : vector<4x256xi1>, vector<4x256xf32>
    %87 = vector.extract_strided_slice %0 {offsets = [0, 3], sizes = [4, 1], strides = [1, 1]} : vector<4x9xf32> to vector<4x1xf32>
    %88 = vector.broadcast %87 : vector<4x1xf32> to vector<4x256xf32>
    %89 = arith.mulf %86, %88 : vector<4x256xf32>
    %90 = arith.addf %69, %89 : vector<4x256xf32>
    %c0_36 = arith.constant 0 : index
    %c0_37 = arith.constant 0 : index
    %c0_38 = arith.constant 0 : index
    %91 = vector.load %arg2[%c0_36, %c0_37, %c0_38] : memref<1x4x256xf32, #tpu.memory_space<vmem>>, vector<1x4x256xf32>
    %92 = vector.shape_cast %91 : vector<1x4x256xf32> to vector<4x256xf32>
    %93 = vector.extract_strided_slice %0 {offsets = [0, 4], sizes = [4, 1], strides = [1, 1]} : vector<4x9xf32> to vector<4x1xf32>
    %94 = vector.broadcast %93 : vector<4x1xf32> to vector<4x256xf32>
    %95 = arith.mulf %92, %94 : vector<4x256xf32>
    %96 = arith.addf %90, %95 : vector<4x256xf32>
    %c0_39 = arith.constant 0 : index
    %c0_40 = arith.constant 0 : index
    %c1 = arith.constant 1 : index
    %97 = vector.load %arg2[%c0_39, %c0_40, %c1] : memref<1x4x256xf32, #tpu.memory_space<vmem>>, vector<1x4x255xf32>
    %98 = vector.shape_cast %97 : vector<1x4x255xf32> to vector<4x255xf32>
    %cst_41 = arith.constant 0.000000e+00 : f32
    %99 = vector.broadcast %cst_41 : f32 to vector<4x1xf32>
    %100 = tpu.concatenate %98, %99 in 1 : vector<4x255xf32>, vector<4x1xf32> -> vector<4x256xf32>
    %c1_i32_42 = arith.constant 1 : i32
    %101 = vector.broadcast %c1_i32_42 : i32 to vector<1x256xi32>
    %102 = arith.addi %18, %101 : vector<1x256xi32>
    %c0_i32_43 = arith.constant 0 : i32
    %103 = vector.broadcast %c0_i32_43 : i32 to vector<1x256xi32>
    %104 = arith.cmpi sge, %102, %103 : vector<1x256xi32>
    %c1_i32_44 = arith.constant 1 : i32
    %105 = vector.broadcast %c1_i32_44 : i32 to vector<1x256xi32>
    %106 = arith.addi %18, %105 : vector<1x256xi32>
    %c16_i32_45 = arith.constant 16 : i32
    %107 = vector.broadcast %c16_i32_45 : i32 to vector<1x256xi32>
    %108 = arith.cmpi slt, %106, %107 : vector<1x256xi32>
    %109 = arith.andi %104, %108 : vector<1x256xi1>
    %cst_46 = arith.constant 0.000000e+00 : f32
    %110 = vector.shape_cast %109 : vector<1x256xi1> to vector<1x256xi1>
    %111 = vector.broadcast %110 : vector<1x256xi1> to vector<4x256xi1>
    %112 = vector.broadcast %cst_46 : f32 to vector<4x256xf32>
    %113 = arith.select %111, %100, %112 : vector<4x256xi1>, vector<4x256xf32>
    %114 = vector.extract_strided_slice %0 {offsets = [0, 5], sizes = [4, 1], strides = [1, 1]} : vector<4x9xf32> to vector<4x1xf32>
    %115 = vector.broadcast %114 : vector<4x1xf32> to vector<4x256xf32>
    %116 = arith.mulf %113, %115 : vector<4x256xf32>
    %117 = arith.addf %96, %116 : vector<4x256xf32>
    %c0_47 = arith.constant 0 : index
    %c0_48 = arith.constant 0 : index
    %c15 = arith.constant 15 : index
    %118 = vector.load %arg2[%c0_47, %c0_48, %c15] : memref<1x4x256xf32, #tpu.memory_space<vmem>>, vector<1x4x241xf32>
    %119 = vector.shape_cast %118 : vector<1x4x241xf32> to vector<4x241xf32>
    %cst_49 = arith.constant 0.000000e+00 : f32
    %120 = vector.broadcast %cst_49 : f32 to vector<4x15xf32>
    %121 = tpu.concatenate %119, %120 in 1 : vector<4x241xf32>, vector<4x15xf32> -> vector<4x256xf32>
    %c-1_i32_50 = arith.constant -1 : i32
    %122 = vector.broadcast %c-1_i32_50 : i32 to vector<1x256xi32>
    %123 = arith.addi %18, %122 : vector<1x256xi32>
    %c0_i32_51 = arith.constant 0 : i32
    %124 = vector.broadcast %c0_i32_51 : i32 to vector<1x256xi32>
    %125 = arith.cmpi sge, %123, %124 : vector<1x256xi32>
    %c-1_i32_52 = arith.constant -1 : i32
    %126 = vector.broadcast %c-1_i32_52 : i32 to vector<1x256xi32>
    %127 = arith.addi %18, %126 : vector<1x256xi32>
    %c16_i32_53 = arith.constant 16 : i32
    %128 = vector.broadcast %c16_i32_53 : i32 to vector<1x256xi32>
    %129 = arith.cmpi slt, %127, %128 : vector<1x256xi32>
    %130 = arith.andi %125, %129 : vector<1x256xi1>
    %cst_54 = arith.constant 0.000000e+00 : f32
    %131 = vector.shape_cast %130 : vector<1x256xi1> to vector<1x256xi1>
    %132 = vector.broadcast %131 : vector<1x256xi1> to vector<4x256xi1>
    %133 = vector.broadcast %cst_54 : f32 to vector<4x256xf32>
    %134 = arith.select %132, %121, %133 : vector<4x256xi1>, vector<4x256xf32>
    %135 = vector.extract_strided_slice %0 {offsets = [0, 6], sizes = [4, 1], strides = [1, 1]} : vector<4x9xf32> to vector<4x1xf32>
    %136 = vector.broadcast %135 : vector<4x1xf32> to vector<4x256xf32>
    %137 = arith.mulf %134, %136 : vector<4x256xf32>
    %138 = arith.addf %117, %137 : vector<4x256xf32>
    %c0_55 = arith.constant 0 : index
    %c0_56 = arith.constant 0 : index
    %c16 = arith.constant 16 : index
    %139 = vector.load %arg2[%c0_55, %c0_56, %c16] : memref<1x4x256xf32, #tpu.memory_space<vmem>>, vector<1x4x240xf32>
    %140 = vector.shape_cast %139 : vector<1x4x240xf32> to vector<4x240xf32>
    %cst_57 = arith.constant 0.000000e+00 : f32
    %141 = vector.broadcast %cst_57 : f32 to vector<4x16xf32>
    %142 = tpu.concatenate %140, %141 in 1 : vector<4x240xf32>, vector<4x16xf32> -> vector<4x256xf32>
    %143 = vector.extract_strided_slice %0 {offsets = [0, 7], sizes = [4, 1], strides = [1, 1]} : vector<4x9xf32> to vector<4x1xf32>
    %144 = vector.broadcast %143 : vector<4x1xf32> to vector<4x256xf32>
    %145 = arith.mulf %142, %144 : vector<4x256xf32>
    %146 = arith.addf %138, %145 : vector<4x256xf32>
    %c0_58 = arith.constant 0 : index
    %c0_59 = arith.constant 0 : index
    %c17 = arith.constant 17 : index
    %147 = vector.load %arg2[%c0_58, %c0_59, %c17] : memref<1x4x256xf32, #tpu.memory_space<vmem>>, vector<1x4x239xf32>
    %148 = vector.shape_cast %147 : vector<1x4x239xf32> to vector<4x239xf32>
    %cst_60 = arith.constant 0.000000e+00 : f32
    %149 = vector.broadcast %cst_60 : f32 to vector<4x17xf32>
    %150 = tpu.concatenate %148, %149 in 1 : vector<4x239xf32>, vector<4x17xf32> -> vector<4x256xf32>
    %c1_i32_61 = arith.constant 1 : i32
    %151 = vector.broadcast %c1_i32_61 : i32 to vector<1x256xi32>
    %152 = arith.addi %18, %151 : vector<1x256xi32>
    %c0_i32_62 = arith.constant 0 : i32
    %153 = vector.broadcast %c0_i32_62 : i32 to vector<1x256xi32>
    %154 = arith.cmpi sge, %152, %153 : vector<1x256xi32>
    %c1_i32_63 = arith.constant 1 : i32
    %155 = vector.broadcast %c1_i32_63 : i32 to vector<1x256xi32>
    %156 = arith.addi %18, %155 : vector<1x256xi32>
    %c16_i32_64 = arith.constant 16 : i32
    %157 = vector.broadcast %c16_i32_64 : i32 to vector<1x256xi32>
    %158 = arith.cmpi slt, %156, %157 : vector<1x256xi32>
    %159 = arith.andi %154, %158 : vector<1x256xi1>
    %cst_65 = arith.constant 0.000000e+00 : f32
    %160 = vector.shape_cast %159 : vector<1x256xi1> to vector<1x256xi1>
    %161 = vector.broadcast %160 : vector<1x256xi1> to vector<4x256xi1>
    %162 = vector.broadcast %cst_65 : f32 to vector<4x256xf32>
    %163 = arith.select %161, %150, %162 : vector<4x256xi1>, vector<4x256xf32>
    %164 = vector.extract_strided_slice %0 {offsets = [0, 8], sizes = [4, 1], strides = [1, 1]} : vector<4x9xf32> to vector<4x1xf32>
    %165 = vector.broadcast %164 : vector<4x1xf32> to vector<4x256xf32>
    %166 = arith.mulf %163, %165 : vector<4x256xf32>
    %167 = arith.addf %146, %166 : vector<4x256xf32>
    %168 = vector.broadcast %1 : vector<4x1xf32> to vector<4x256xf32>
    %169 = arith.addf %167, %168 : vector<4x256xf32>
    %cst_66 = arith.constant 0.000000e+00 : f32
    %170 = vector.broadcast %cst_66 : f32 to vector<4x256xf32>
    %171 = arith.maximumf %169, %170 : vector<4x256xf32>
    %c0_67 = arith.constant 0 : index
    %c0_68 = arith.constant 0 : index
    %c0_69 = arith.constant 0 : index
    %172 = vector.load %arg5[%c0_67, %c0_68, %c0_69] : memref<1x4x256xf32, #tpu.memory_space<vmem>>, vector<1x4x256xf32>
    %173 = vector.shape_cast %172 : vector<1x4x256xf32> to vector<4x256xf32>
    %174 = vector.shape_cast %171 : vector<4x256xf32> to vector<1x4x256xf32>
    tpu.vector_store %arg5[%c0_67, %c0_68, %c0_69], %174 {strides = array<i32>} : memref<1x4x256xf32, #tpu.memory_space<vmem>>, vector<1x4x256xf32>,
    return
  }
  func.func @transform_0(%arg0: i32, %arg1: i32) -> (i32, i32, i32) {
    %c0_i32 = arith.constant 0 : i32
    %c0_i32_0 = arith.constant 0 : i32
    return %arg0, %arg1, %c0_i32 : i32, i32, i32
  }
  func.func @transform_1(%arg0: i32, %arg1: i32) -> (i32, i32) {
    %c0_i32 = arith.constant 0 : i32
    %c0_i32_0 = arith.constant 0 : i32
    return %arg1, %c0_i32 : i32, i32
  }
  func.func @transform_2(%arg0: i32, %arg1: i32) -> (i32, i32) {
    %c0_i32 = arith.constant 0 : i32
    %c0_i32_0 = arith.constant 0 : i32
    return %arg1, %c0_i32 : i32, i32
  }
  func.func @transform_3(%arg0: i32, %arg1: i32) -> (i32, i32, i32) {
    %c0_i32 = arith.constant 0 : i32
    %c0_i32_0 = arith.constant 0 : i32
    return %arg0, %arg1, %c0_i32 : i32, i32, i32
  }
}

</mosaic_0001>

<bundles_post_ra>
// kernel: tpu_custom_call.1
= control target key start
LH: loop header
LB: loop body
LE: loop exit
PB: predicated region body
PF: predicated region fallthrough
CT: control target
= control target key end

     0   :  { %8 = vsyncpa [#allocation3], 0  ;;  %s1136_s0 = inlined_call_operand.hbm [shape: f32[2,4,256], index: 0, kind: input, shape index: {}]   ;;  %s1137_s1 = inlined_call_operand.vmem [shape: f32[4,9], index: 1, kind: input, shape index: {}]   ;;  %s1138_s2 = inlined_call_operand.vmem [shape: f32[4,1], index: 2, kind: input, shape index: {}]   ;;  %s1139_s3 = inlined_call_operand.hbm [shape: f32[2,4,256], index: 3, kind: output, shape index: {}]  }
   0x1   :  { %10 = vsyncpa [#allocation3 + $0x1], 0 }
   0x2   :  { %11 = vsyncpa [#allocation4], 0 }
   0x3   :  { %13 = vsyncpa [#allocation4 + $0x1], 0  ;;  %s892_s12 = smov 0   ;;  %s894_s13 = smov 0  }
   0x4   :  { %s896_s14 = smov 0   ;;  %s898_s15 = smov 0  }
   0x5   :  { %s900_s16 = smov 0   ;;  %s902_s17 = smov 0  }
   0x6 LB: > { %s628_s18 = sadd.s32 4294967295, %s850_s17   ;;  %s629_s19 = sadd.s32 4294967294, %s850_s17   ;;  %s850_s17 = sphi %s902_s17, %s19_s17   ;;  %s846_s16 = sphi %s900_s16, %s1155_s16   ;;  %s842_s15 = sphi %s898_s15, %s1154_s15   ;;  %s838_s14 = sphi %s896_s14, %s1153_s14   ;;  %s834_s13 = sphi %s894_s13, %s1152_s13   ;;  %s830_s12 = sphi %s892_s12, %s1151_s12  }
   0x7   : > { %s31_s20 = sadd.s32 1, %s846_s16  ;;  %s40_s21 = sadd.s32 1, %s838_s14 }
   0x8   : > { %p33_p0 = scmp.ge.s32.totalorder %s31_s20, 2  ;;  %p47_p1 = scmp.ne.s32.totalorder %s838_s14, %s834_s13 }
   0x9   : > { %p48_p2 = scmp.eq.s32.totalorder %s850_s17, 0  ;;  %p53_p3 = scmp.ne.s32.totalorder %s834_s13, %s830_s12 }
   0xa   : > { %s1157_s20 = smov (%p33_p0, %s31_s20), 0  ;;  %p54_p5 = scmp.eq.s32.totalorder %s628_s18, 0 }
   0xb   : > { %p933_p4 = por %p48_p2, %p47_p1  ;;  %s35_s23 = ssub.s32 %s846_s16, %s1157_s20 }
   0xc   : > { %p131_p6 = scmp.eq.s32.totalorder %s628_s18, 1  ;;  %p38_p7 = scmp.eq.s32.totalorder %s35_s23, 0 }
   0xd   : > { %p939_p8 = por %p54_p5, %p53_p3  ;;  %p137_p10 = scmp.eq.s32.totalorder %s629_s19, 1 }
   0xe   : > { %p943_p9 = por %p131_p6, %p47_p1  ;;  %p659_p13 = scmp.lt.s32.totalorder %s850_s17, 2 }
   0xf   : > { %s948_s26 = scalar_select %p38_p7, %s838_s14, %s40_s21  }
  0x10   : > { %s1143_s25 = scalar_select %p943_p9, 1, 0 }
  0x11   : > { %p950_p11 = por %p137_p10, %p53_p3  ;;  %s171_s28 = sand.u32 1, %s838_s14  }
  0x12   : > { %s634_s29 = sshll.u32 %s171_s28, 3  ;;  %s645_s30 = sshll.u32 %s846_s16, 7 }
  0x13   : > { %s1144_s27 = scalar_select %p950_p11, 1, 0 }
  0x14   : > { %s961_s6 = scalar_lea.hbm %s1136_s0, %s645_s30  ;;  %s175_s7 = scalar_lea.vmem [#allocation2], %s634_s29 }
  0x15   : > { %s185_s8 = sshll.u32 %s175_s7, 4  ;;  %p967_p0 = pnand %p659_p13, %p933_p4  ;;  %s963_s8 = int_to_ptr.vmem [resolvable:$true] %s185_s8 }
  0x16   : > { %s172_s10 = scalar_lea.sflag [#allocation3], %s171_s28  ;;  %s738_s11 = scalar_lea.hbm %s961_s6, 128 }
  0x17   : > { %p739_p3 = scmp.ne.s32.totalorder %s961_s6, %s738_s11  ;;  %p740_p5 = pneg %p967_p0 }
  0x18   : > { %s743_s21 = scalar_lea.hbm %s1136_s0, 256  ;;  %p744_p4 = scmp.lt.u32.totalorder %s961_s6, %s1136_s0 }
  0x19   : > { %p741_p6 = pnand %p740_p5, %p739_p3  ;;  %p745_p10 = scmp.lt.u32.totalorder %s743_s21, %s738_s11 }
  0x1a   : > { %p747_p12 = scmp.lt.u32.totalorder %s738_s11, %s961_s6 }
  0x1b   : > { %p742_p7 = pneg %p741_p6  ;;  %p746_p13 = por %p745_p10, %p744_p4 }
  0x1d   : > { %p748_p1 = por %p747_p12, %p746_p13 }
  0x1f   : > { %p749_p2 = pnand %p748_p1, %p742_p7 }
  0x21   : > { %752 = shalt.err (!%p749_p2)
}
  0x22   : > { %s753_s28 = scalar_lea.vmem %s963_s8, 128  ;;  %s852_s29 = smov [#allocation2]  }
  0x23   : > { %p754_p3 = scmp.ne.s32.totalorder %s963_s8, %s753_s28  ;;  %s758_s30 = sshll.u32 %s852_s29, 4  ;;  %s759_s30 = int_to_ptr.vmem [resolvable:$false] %s758_s30 }
  0x24   : > { %s760_s4 = scalar_lea.vmem %s759_s30, 256  ;;  %p761_p9 = scmp.lt.s32.totalorder %s963_s8, %s759_s30 }
  0x25   : > { %p756_p6 = pnand %p754_p3, %p740_p5  ;;  %p762_p4 = scmp.lt.s32.totalorder %s760_s4, %s753_s28 }
  0x27   : > { %p757_p11 = pneg %p756_p6  ;;  %p763_p10 = por %p762_p4, %p761_p9 }
  0x29   : > { %p764_p12 = pnand %p763_p10, %p757_p11 }
  0x2b   : > { %767 = shalt.err (!%p764_p12)
}
  0x2c   : > { %654 = dma.hbm_to_vmem [thread:$0]  (!%p967_p0), %s961_s6, 128, %s963_s8, %s172_s10  }
  0x2d   : > { %p1146_p1 = scmp.lt.s32.totalorder %s850_s17, 3  ;;  %p1147_p2 = scmp.ge.s32.totalorder %s850_s17, 1 }
  0x2f   : > { %p191_p5 = pnand %p1147_p2, %p1146_p1 }
  0x30   : > { %s1003_s5 = sand.u32 (!%p191_p5), 1, %s834_s13  }
  0x31   : > { %194 = sbr.rel (%p191_p5) target bundleno = 271 (0x10f), region = 32  ;;  %s638_s7 = sshll.u32 (!%p191_p5), %s1003_s5, 3 }
  0x32   : > { %s197_s11 = scalar_lea.sflag (!%p191_p5), [#allocation3], %s1003_s5  ;;  %s200_s9 = scalar_lea.vmem (!%p191_p5), [#allocation2], %s638_s7 }
  0x38   : > { %821 = dma.done.wait (%p939_p8), %s197_s11, 128  }
  0x39   : > { %823 = vsyncadd (%p939_p8), %s197_s11, 4294967168  ;;  %v853_v0 = vmov 2   ;;  %v854_v1 = vmov 0   ;;  %v239_v2 = vld [vmem:[%s1137_s1] sm:$0xf]  ;;  %v855_v3 = vmov 4   ;;  %v241_v20 = vlaneseq }
  0x3a   : > { %729 = vset.pattern.permute.xlu1 %v853_v0  ;;  %727 = vset.pattern.permute.xlu0 %v854_v1  ;;  %v856_v4 = vmov 1   ;;  %v1016_v5 = vld [vmem:[%s200_s9] sm:$0xff]  ;;  %v857_v6 = vmov 3   ;;  %s858_s24 = smov 17   ;;  %v859_v8 = vmov 5   ;;  %s860_s10 = smov 16  }
  0x3b   : > { %350 = vperm.xlu1 %729, %v239_v2   ;;  %296 = vperm.xlu0 %727, %v239_v2   ;;  %v270_v7 = vcombine.high %v1016_v5, %v1016_v5  ;;  %v861_v9 = vmov 7   ;;  %s862_s18 = smov 15   ;;  %v863_v10 = vmov 6   ;;  %s864_s19 = smov 1   ;;  %v868_v11 = vmov 8  }
  0x3c   : > { %s865_s21 = smov 127   ;;  %s866_s22 = smov 113   ;;  %v240_v12 = vld [vmem:[%s1138_s2] sm:$0xf]  ;;  %v242_v22 = vand.u32 127, %v241_v20  ;;  %v387_v34 = vshrl.u32 %v241_v20, 7 }
  0x3d   : > { %s867_s23 = smov 112   ;;  %s869_s30 = smov 111   ;;  %v870_v27 = vmov 839922192   ;;  %vm275_vm0 = vcmask 138240   ;;  %vm310_vm2 = vcmask 130048  }
  0x3e   : > { %v243_v25 = vadd.s32 128, %v242_v22  ;;  %v248_v26 = vand.u32 15, %v242_v22  ;;  %v384_v28 = vunpack.c.l.s4 %v870_v27  ;;  %vm330_vm3 = vcmask 121856   ;;  %s646_s4 = sshll.u32 %s842_s15, 7  ;;  %s230_s11 = scalar_lea.vmem [#allocation5], %s638_s7 }
  0x3f   : > { %730 = vset.pattern.permute.xlu1 %v855_v3  ;;  %728 = vset.pattern.permute.xlu0 %v856_v4  ;;  %vm364_vm6 = vcmask 7168   ;;  %vm404_vm8 = vcmask 1039360   ;;  %vm426_vm9 = vcmask 924672   ;;  %vm448_vm10 = vcmask 916480   ;;  %s514_s9 = sshll.u32 %s230_s11, 4  ;;  %p1148_p9 = scmp.ne.s32.totalorder %s1143_s25, 0  ;;  %s1089_s9 = int_to_ptr.vmem [resolvable:$true] %s514_s9 }
  0x40   : > { %381 = vperm.xlu1 %730, %v239_v2   ;;  %316 = vperm.xlu0 %728, %v239_v2   ;;  %v255_v31 = vand.u32 15, %v243_v25  ;;  %v1037_v32 = vadd.s32 4294967295, %v248_v26  ;;  %v385_v33 = vunpack.c.0.s8 %v384_v28  ;;  %v1044_v40 = vadd.s32 1, %v248_v26  ;;  %s871_s15 = smov [#allocation5]  }
  0x41   : > { %vm468_vm11 = vcmask 908288   ;;  %s772_s7 = sshll.u32 %s871_s15, 4  ;;  %s773_s7 = int_to_ptr.vmem [resolvable:$false] %s772_s7 }
  0x42   : > { %v281_v37 = vadd.s32 4294967295, %v255_v31  ;;  %v1041_v38 = vadd.s32 1, %v255_v31  ;;  %vm282_vm1 = vcmp.ge.s32.totalorder %v1037_v32, 0  ;;  %v388_v41 = vsub.s32 %v385_v33, %v387_v34  ;;  %p775_p7 = scmp.lt.s32.totalorder %s1089_s9, %s773_s7 }
  0x43   : > { %vm339_vm7 = vcmp.lt.s32.totalorder %v1044_v40, 16 }
  0x44   : > { %731 = vset.pattern.permute.xlu1 %v857_v6  ;;  %271 = vrot.lane.b32.xlu0 %v1016_v5, %s858_s24  ;;  %vm283_vm4 = vcmp.ge.s32.totalorder %v281_v37, 0  ;;  %vm340_vm5 = vcmp.lt.s32.totalorder %v1041_v38, 16 }
  0x45   : > { %372 = vperm.xlu1 %731, %v239_v2   ;;  %732 = vset.pattern.permute.xlu0 %v859_v8 }
  0x48   : > { %306 = vrot.lane.b32.xlu0 %v1016_v5, %s860_s10 }
  0x49   : > { %273 = vrot.lane.b32.xlu1 %v270_v7, %s858_s24  ;;  %s1087_s24 = scalar_lea.hbm %s1139_s3, %s646_s4 }
  0x4a   : > { %734 = vset.pattern.permute.xlu1 %v861_v9 }
  0x4c   : > { %326 = vrot.lane.b32.xlu0 %v1016_v5, %s862_s18 }
  0x4d   : > { %308 = vrot.lane.b32.xlu1 %v270_v7, %s860_s10  ;;  %s498_s10 = scalar_lea.sflag [#allocation4], %s1003_s5 }
  0x50   : > { %412 = vperm.xlu0 %732, %v239_v2  }
  0x51   : > { %328 = vrot.lane.b32.xlu1 %v270_v7, %s862_s18  ;;  %s768_s18 = scalar_lea.vmem %s1089_s9, 128 }
  0x52   : > { %p769_p8 = scmp.ne.s32.totalorder %s1089_s9, %s768_s18 }
  0x54   : > { %733 = vset.pattern.permute.xlu0 %v863_v10  ;;  %p770_p11 = pnand %p769_p8, %p1148_p9 }
  0x55   : > { %360 = vrot.lane.b32.xlu1 %v1016_v5, %s864_s19  ;;  %434 = vperm.xlu0 %733, %v239_v2  }
  0x56   : > { %p771_p0 = pneg %p770_p11 }
  0x59   : > { %362 = vrot.lane.b32.xlu1 %v270_v7, %s864_s19  ;;  %402 = vrot.lane.b32.xlu0 %v270_v7, %s865_s21  ;;  %s774_s19 = scalar_lea.vmem %s773_s7, 256 }
  0x5a   : > { %736 = vset.pattern.permute.xlu0 %v854_v1  ;;  %p776_p13 = scmp.lt.s32.totalorder %s774_s19, %s768_s18 }
  0x5c   : > { %p777_p3 = por %p776_p13, %p775_p7 }
  0x5d   : > { %454 = vperm.xlu1 %734, %v239_v2   ;;  %422 = vrot.lane.b32.xlu0 %v1016_v5, %s866_s22 }
  0x5e   : > { %p778_p6 = pnand %p777_p3, %p771_p0 }
  0x61   : > { %400 = vrot.lane.b32.xlu1 %v1016_v5, %s865_s21  ;;  %444 = vrot.lane.b32.xlu0 %v1016_v5, %s867_s23 }
  0x62   : > { %735 = vset.pattern.permute.xlu1 %v868_v11 }
  0x65   : > { %476 = vperm.xlu1 %735, %v239_v2   ;;  %485 = vperm.xlu0 %736, %v240_v12  }
  0x69   : > { %424 = vrot.lane.b32.xlu1 %v270_v7, %s866_s22 }
  0x6d   : > { %446 = vrot.lane.b32.xlu1 %v270_v7, %s867_s23 }
  0x71   : > { %464 = vrot.lane.b32.xlu1 %v1016_v5, %s869_s30 }
  0x75   : > { %466 = vrot.lane.b32.xlu1 %v270_v7, %s869_s30 }
  0xba   : > { %v1031_v13 = vpop.permute.xlu1 %350  ;;  %v297_v14 = vpop.permute.xlu0 %296 }
  0xbf   : > { %v1033_v15 = vpop.permute.xlu1 %381  ;;  %v317_v16 = vpop.permute.xlu0 %316 }
  0xc0   : > { %v389_v58 = vrot.slane %v1033_v15, %v388_v41 }
  0xc2   : > { %v391_v7 = vmul.f32 %v389_v58, %v1016_v5 }
  0xc3   : > { %v272_v18 = vpop.permute.xlu0 %271 }
  0xc4   : > { %v1035_v17 = vpop.permute.xlu1 %372  ;;  %v279_v39 = vsel %vm275_vm0, 0.0, %v272_v18 }
  0xc5   : > { %v292_v45 = vsel %vm282_vm1, %v279_v39, 0.0 }
  0xc6   : > { %v299_v54 = vmul.f32 %v297_v14, %v292_v45 }
  0xc7   : > { %v307_v23 = vpop.permute.xlu0 %306 }
  0xc8   : > { %v274_v19 = vpop.permute.xlu1 %273  ;;  %v314_v46 = vsel %vm310_vm2, 0.0, %v307_v23 }
  0xc9   : > { %v276_v43 = vsel %vm275_vm0, %v272_v18, %v274_v19  ;;  %v319_v55 = vmul.f32 %v317_v16, %v314_v46 }
  0xca   : > { %v293_v51 = vsel %vm283_vm4, %v276_v43, 0.0 }
  0xcb   : > { %v327_v29 = vpop.permute.xlu0 %326  ;;  %v300_v61 = vmul.f32 %v297_v14, %v293_v51  ;;  %v321_v2 = vadd.f32 %v319_v55, %v299_v54 }
  0xcc   : > { %v309_v21 = vpop.permute.xlu1 %308  ;;  %v334_v49 = vsel %vm330_vm3, 0.0, %v327_v29 }
  0xcd   : > { %v311_v47 = vsel %vm310_vm2, %v307_v23, %v309_v21  ;;  %v347_v59 = vsel %vm339_vm7, %v334_v49, 0.0  ;;  %v393_v21 = vcombine.high %v391_v7, %v391_v7 }
  0xce   : > { %v320_v56 = vmul.f32 %v317_v16, %v311_v47  ;;  %v353_v3 = vmul.f32 %v1031_v13, %v347_v59 }
  0xcf   : > { %v1039_v35 = vpop.permute.xlu0 %412 }
  0xd0   : > { %v329_v24 = vpop.permute.xlu1 %328  ;;  %v322_v4 = vadd.f32 %v320_v56, %v300_v61  ;;  %v355_v15 = vadd.f32 %v353_v3, %v321_v2 }
  0xd1   : > { %v331_v44 = vsel %vm330_vm3, %v327_v29, %v329_v24 }
  0xd2   : > { %v348_v52 = vsel %vm340_vm5, %v331_v44, 0.0 }
  0xd3   : > { %v354_v62 = vmul.f32 %v1031_v13, %v348_v52 }
  0xd4   : > { %v361_v30 = vpop.permute.xlu1 %360  ;;  %v435_v48 = vpop.permute.xlu0 %434 }
  0xd5   : > { %v368_v57 = vsel %vm364_vm6, 0.0, %v361_v30  ;;  %v356_v8 = vadd.f32 %v354_v62, %v322_v4 }
  0xd6   : > { %v369_v63 = vsel %vm282_vm1, %v368_v57, 0.0 }
  0xd7   : > { %v375_v9 = vmul.f32 %v1035_v17, %v369_v63 }
  0xd8   : > { %v363_v36 = vpop.permute.xlu1 %362  ;;  %v403_v0 = vpop.permute.xlu0 %402 }
  0xd9   : > { %v365_v50 = vsel %vm364_vm6, %v361_v30, %v363_v36  ;;  %v408_v10 = vsel %vm404_vm8, %v403_v0, 0.0  ;;  %v377_v5 = vadd.f32 %v375_v9, %v355_v15 }
  0xda   : > { %v370_v60 = vsel %vm283_vm4, %v365_v50, 0.0  ;;  %v410_v13 = vsel %vm340_vm5, %v408_v10, 0.0 }
  0xdb   : > { %v376_v6 = vmul.f32 %v1035_v17, %v370_v60  ;;  %v416_v25 = vmul.f32 %v1039_v35, %v410_v13  ;;  %v395_v27 = vadd.f32 %v391_v7, %v377_v5 }
  0xdc   : > { %v1046_v42 = vpop.permute.xlu1 %454  ;;  %v423_v12 = vpop.permute.xlu0 %422 }
  0xdd   : > { %v378_v16 = vadd.f32 %v376_v6, %v356_v8 }
  0xdf   : > { %v396_v24 = vadd.f32 %v393_v21, %v378_v16 }
  0xe0   : > { %v401_v53 = vpop.permute.xlu1 %400  ;;  %v445_v30 = vpop.permute.xlu0 %444 }
  0xe1   : > { %v405_v11 = vsel %vm404_vm8, %v401_v53, %v403_v0  ;;  %v418_v36 = vadd.f32 %v416_v25, %v396_v24 }
  0xe2   : > { %v409_v20 = vsel %vm339_vm7, %v405_v11, 0.0 }
  0xe3   : > { %v415_v26 = vmul.f32 %v1039_v35, %v409_v20 }
  0xe4   : > { %v477_v1 = vpop.permute.xlu1 %476  ;;  %v486_v52 = vpop.permute.xlu0 %485 }
  0xe5   : > { %v417_v39 = vadd.f32 %v415_v26, %v395_v27 }
  0xe8   : > { %v425_v14 = vpop.permute.xlu1 %424 }
  0xe9   : > { %v427_v18 = vsel %vm426_vm9, %v423_v12, %v425_v14  ;;  %v430_v19 = vsel %vm426_vm9, %v425_v14, 0.0 }
  0xea   : > { %v431_v22 = vsel %vm282_vm1, %v427_v18, 0.0  ;;  %v432_v17 = vsel %vm283_vm4, %v430_v19, 0.0 }
  0xeb   : > { %v437_v28 = vmul.f32 %v435_v48, %v431_v22  ;;  %v438_v29 = vmul.f32 %v435_v48, %v432_v17 }
  0xec   : > { %v447_v23 = vpop.permute.xlu1 %446 }
  0xed   : > { %v449_v31 = vsel %vm448_vm10, %v445_v30, %v447_v23  ;;  %v452_v33 = vsel %vm448_vm10, %v447_v23, 0.0  ;;  %v439_v32 = vadd.f32 %v437_v28, %v417_v39  ;;  %v440_v37 = vadd.f32 %v438_v29, %v418_v36 }
  0xee   : > { %v457_v41 = vmul.f32 %v1046_v42, %v449_v31  ;;  %v458_v43 = vmul.f32 %v1046_v42, %v452_v33 }
  0xf0   : > { %v465_v34 = vpop.permute.xlu1 %464  ;;  %v459_v50 = vadd.f32 %v457_v41, %v439_v32  ;;  %v460_v51 = vadd.f32 %v458_v43, %v440_v37 }
  0xf4   : > { %v467_v35 = vpop.permute.xlu1 %466 }
  0xf5   : > { %v469_v44 = vsel %vm468_vm11, %v465_v34, %v467_v35  ;;  %v472_v45 = vsel %vm468_vm11, %v467_v35, 0.0 }
  0xf6   : > { %v473_v46 = vsel %vm339_vm7, %v469_v44, 0.0  ;;  %v474_v47 = vsel %vm340_vm5, %v472_v45, 0.0 }
  0xf7   : > { %v479_v48 = vmul.f32 %v477_v1, %v473_v46  ;;  %v480_v49 = vmul.f32 %v477_v1, %v474_v47 }
  0xf9   : > { %v481_v53 = vadd.f32 %v479_v48, %v459_v50  ;;  %v482_v54 = vadd.f32 %v480_v49, %v460_v51 }
  0xfb   : > { %v488_v42 = vadd.f32 %v486_v52, %v481_v53  ;;  %v489_v55 = vadd.f32 %v486_v52, %v482_v54 }
  0xfd   : > { %v490_v40 = vmax.f32 %v488_v42, 0.0  ;;  %v491_v56 = vmax.f32 %v489_v55, 0.0 }
  0xff   : > { %v494_v57 = vcombine.low %v490_v40, %v491_v56 }
 0x101   : > { %496 = vst [vmem:[%s230_s11] sm:$0xff] %v494_v57 }
 0x102   : > { %781 = shalt.err (!%p778_p6)
}
 0x103   : > { %s782_s5 = scalar_lea.hbm %s1087_s24, 128  ;;  %s786_s23 = scalar_lea.hbm %s1139_s3, 256 }
 0x104   : > { %p783_p4 = scmp.ne.s32.totalorder %s1087_s24, %s782_s5  ;;  %p787_p1 = scmp.lt.u32.totalorder %s1087_s24, %s1139_s3 }
 0x105   : > { %p788_p2 = scmp.lt.u32.totalorder %s786_s23, %s782_s5  ;;  %p790_p8 = scmp.lt.u32.totalorder %s782_s5, %s1087_s24 }
 0x106   : > { %p784_p10 = pnand %p783_p4, %p1148_p9 }
 0x107   : > { %p789_p5 = por %p788_p2, %p787_p1 }
 0x108   : > { %p785_p12 = pneg %p784_p10 }
 0x109   : > { %p791_p11 = por %p790_p8, %p789_p5 }
 0x10b   : > { %p792_p0 = pnand %p791_p11, %p785_p12 }
 0x10d   : > { %795 = shalt.err (!%p792_p0)
}
 0x10e   : > { %649 = dma.vmem_to_hbm [thread:$0]  (%p1148_p9), %s1089_s9, 128, %s1087_s24, %s498_s10  }
 0x10f PF: > { %s526_s30 = sand.u32 1, %s830_s12   ;;  %p1149_p7 = scmp.ne.s32.totalorder %s1144_s27, 0 }
 0x110   : > { %p1150_p13 = scmp.ge.s32.totalorder %s850_s17, 2  ;;  %s527_s4 = scalar_lea.sflag [#allocation4], %s526_s30 }
 0x112   : > { %p656_p3 = pnand %p1150_p13, %p1149_p7 }
 0x114   : > { %825 = dma.done.wait (!%p656_p3), %s527_s4, 128  }
 0x115   : > { %827 = vsyncadd (!%p656_p3), %s527_s4, 4294967168  ;;  %s19_s17 = sadd.s32 1, %s850_s17   ;;  %s1151_s12 = smov %s834_s13 }
 0x116   : > { %p16_p6 = scmp.ge.s32.totalorder %s19_s17, 4   ;;  %s1152_s13 = smov %s838_s14 }
 0x117   : > { %s1153_s14 = smov %s948_s26  ;;  %s1154_s15 = smov %s846_s16 }
 0x118   : > { %s1155_s16 = smov %s1157_s20  ;;  %18 = sbr.rel (!%p16_p6) target bundleno = 6 (0x6), region = 83 }
 0x11f   :  { %532 = vsyncpa [#allocation3], 1 }
 0x120   :  { %534 = vsyncpa [#allocation3 + $0x1], 1 }
 0x121   :  { %535 = vsyncpa [#allocation4], 1 }
 0x122   :  { %537 = vsyncpa [#allocation4 + $0x1], 1 }

</bundles_post_ra>
